<compile_context>
chip_gen: v6e
topology: v6e:2x2x1
jax: 0.10.0
libtpu: 0.0.40
codegen_flags: <defaults>
</compile_context>

<pallas_src>
import functools

import jax
import jax.numpy as jnp
from jax.experimental import pallas as pl
from jax.experimental.pallas import tpu as pltpu


def _round_up(n, m):
    return ((n + m - 1) // m) * m


# --------------------------------------------------------------------------- #
# Fused TemporalBlock kernel (one batch row x one time tile per grid step)
# --------------------------------------------------------------------------- #
def _block_kernel(*refs, K, dilation, has_down):
    """conv1(+fused 1x1 downsample)+ReLU+conv2+ReLU+residual+ReLU on a (C, TL) tile.

    The first `halo = (K-1)*dilation` columns of xe_ref/he_ref hold the causal history
    (previous tile's tail; zeros at t == 0) -- exactly the Conv1d(pad) + Chomp1d
    semantics of the PyTorch module, carried across time tiles.
    """
    halo = (K - 1) * dilation
    n_in = 6 if has_down else 5
    x_ref = refs[0]
    w1_ref, b1_ref, w2_ref, b2_ref = refs[1], refs[2], refs[3], refs[4]
    bd_ref = refs[5] if has_down else None
    o_ref = refs[n_in]
    if halo > 0:
        xe_ref, he_ref = refs[n_in + 1], refs[n_in + 2]

    cin, TL = x_ref.shape
    cout = o_ref.shape[0]
    d = dilation
    t = pl.program_id(1)

    x = x_ref[...]                       # operand dtype (bf16 or f32)

    if halo > 0:
        @pl.when(t == 0)
        def _init_history():             # causal left zero-pad at the start of a row
            xe_ref[:, :halo] = jnp.zeros((cin, halo), xe_ref.dtype)
            he_ref[:, :halo] = jnp.zeros((cout, halo), he_ref.dtype)
        xe_ref[:, halo:] = x             # current tile placed next to its history

    # ---- conv1 (+ fused 1x1 downsample rows) --------------------------------
    # Tap K-1 is the un-shifted current tile -> use the register value directly;
    # older taps are read straight from the halo buffer (no staging scratch).
    acc = jnp.dot(w1_ref[K - 1], x, preferred_element_type=jnp.float32)
    for k in range(K - 1):
        acc = acc + jnp.dot(w1_ref[k], xe_ref[:, k * d:k * d + TL],
                            preferred_element_type=jnp.float32)
    h = jnp.maximum(acc[:cout] + b1_ref[...], 0.0)      # relu1 (dropout == identity)
    if has_down:
        res = acc[cout:] + bd_ref[...]                   # fused 1x1 downsample conv
    else:
        res = x.astype(jnp.float32)

    # ---- conv2 ---------------------------------------------------------------
    h_op = h.astype(x.dtype)
    if halo > 0:
        he_ref[:, halo:] = h_op
    acc2 = jnp.dot(w2_ref[K - 1], h_op, preferred_element_type=jnp.float32)
    for k in range(K - 1):
        acc2 = acc2 + jnp.dot(w2_ref[k], he_ref[:, k * d:k * d + TL],
                              preferred_element_type=jnp.float32)
    y = jnp.maximum(acc2 + b2_ref[...], 0.0)             # relu2 (dropout == identity)

    o_ref[...] = jnp.maximum(y + res, 0.0).astype(o_ref.dtype)

    # ---- carry trailing halo columns as the next tile's causal history --------
    if halo > 0:
        xe_ref[:, :halo] = xe_ref[:, TL:TL + halo]
        he_ref[:, :halo] = he_ref[:, TL:TL + halo]


# --------------------------------------------------------------------------- #
# Wrappers
# --------------------------------------------------------------------------- #
def _pad_bias(b, cout_p):
    return jnp.zeros((cout_p, 1), jnp.float32).at[:b.shape[0], 0].set(b.astype(jnp.float32))


def temporal_block(x_p, params, dilation, *, time_tile, op_dtype):
    """Fused TemporalBlock. x_p: (B, cin_p, Lp) channel/time-padded activations."""
    B, cin_p, Lp = x_p.shape
    w1, b1, w2, b2, wd, bd = params
    c_out, c_in, K = w1.shape
    sub = 32 // jnp.dtype(op_dtype).itemsize            # 8 for f32, 16 for bf16 packing
    cout_p = _round_up(c_out, sub)
    halo = (K - 1) * dilation
    has_down = wd is not None
    assert Lp % time_tile == 0 and halo <= time_tile
    nt = Lp // time_tile

    # Per-tap weights w1a[k]: (cout_tot, cin_p).  Rows [cout_p:] of tap K-1 hold the
    # fused 1x1 downsample (tap K-1 multiplies the un-shifted current tile == x).
    cout_tot = 2 * cout_p if has_down else cout_p
    w1a = jnp.zeros((K, cout_tot, cin_p), jnp.float32)
    w1a = w1a.at[:, :c_out, :c_in].set(jnp.transpose(w1, (2, 0, 1)))
    if has_down:
        w1a = w1a.at[K - 1, cout_p:cout_p + c_out, :c_in].set(wd[:, :, 0])
    w2a = jnp.zeros((K, cout_p, cout_p), jnp.float32)
    w2a = w2a.at[:, :c_out, :c_out].set(jnp.transpose(w2, (2, 0, 1)))

    b1p = _pad_bias(b1, cout_p)
    b2p = _pad_bias(b2, cout_p)

    args = [x_p, w1a.astype(op_dtype), b1p, w2a.astype(op_dtype), b2p]
    in_specs = [
        pl.BlockSpec((None, cin_p, time_tile), lambda b, t: (b, 0, t)),
        # Grid-invariant weights/biases (tiny here).  For very large channel counts,
        # single-buffer these (pipeline_mode) and budget against v7x's 64 MiB VMEM.
        pl.BlockSpec((K, cout_tot, cin_p), lambda b, t: (0, 0, 0)),
        pl.BlockSpec((cout_p, 1), lambda b, t: (0, 0)),
        pl.BlockSpec((K, cout_p, cout_p), lambda b, t: (0, 0, 0)),
        pl.BlockSpec((cout_p, 1), lambda b, t: (0, 0)),
    ]
    if has_down:
        bdp = _pad_bias(bd, cout_p)
        args.append(bdp)
        in_specs.append(pl.BlockSpec((cout_p, 1), lambda b, t: (0, 0)))

    scratch = []
    if halo > 0:
        scratch = [
            pltpu.VMEM((cin_p, halo + time_tile), jnp.dtype(op_dtype)),   # x + history
            pltpu.VMEM((cout_p, halo + time_tile), jnp.dtype(op_dtype)),  # h + history
        ]

    kern = functools.partial(_block_kernel, K=K, dilation=dilation, has_down=has_down)
    return pl.pallas_call(
        kern,
        out_shape=jax.ShapeDtypeStruct((B, cout_p, Lp), jnp.dtype(op_dtype)),
        grid=(B, nt),
        in_specs=in_specs,
        out_specs=pl.BlockSpec((None, cout_p, time_tile), lambda b, t: (b, 0, t)),
        scratch_shapes=scratch,
        compiler_params=pltpu.CompilerParams(
            dimension_semantics=("parallel", "arbitrary"),
            vmem_limit_bytes=64 * 1024 * 1024),
    )(*args)


def temporal_conv_net(x, all_params, *, time_tile=None, activation_dtype=jnp.bfloat16):
    """TCN forward (inference). x: (B, C_in, L) -> (B, num_channels[-1], L)."""
    B, c_in, L = x.shape
    op_dtype = jnp.dtype(activation_dtype)
    sub = 32 // op_dtype.itemsize
    cin_p = _round_up(c_in, sub)
    cmax_p = _round_up(max([c_in] + [p[0].shape[0] for p in all_params]), sub)
    if time_tile is None:
        # Large lane-dense tiles amortize per-grid-step overhead; budget the
        # double-buffered x/out blocks + halo scratch against v7x's 64 MiB VMEM.
        tile = _round_up(min(L, 2048), 128)
        budget = 32 * 1024 * 1024
        while tile > 128 and 6 * cmax_p * tile * op_dtype.itemsize > budget:
            tile -= 128
        time_tile = tile
    assert time_tile % 128 == 0
    Lp = _round_up(L, time_tile)
    # Pad channels to a sublane-packing multiple and time to the tile width ONCE.
    h = jnp.zeros((B, cin_p, Lp), op_dtype).at[:, :c_in, :L].set(x.astype(op_dtype))
    c_last = c_in
    for i, params in enumerate(all_params):
        h = temporal_block(h, params, dilation=2 ** i,
                           time_tile=time_tile, op_dtype=op_dtype)
        c_last = params[0].shape[0]
    return h[:, :c_last, :L].astype(x.dtype)


def init_tcn_params(key, num_inputs, num_channels, kernel_size):
    """Effective weights ~ N(0, 0.01) (weight_norm folded), biases ~ N(0, 0.01)."""
    params = []
    for i, out_ch in enumerate(num_channels):
        in_ch = num_inputs if i == 0 else num_channels[i - 1]
        key, k1, k2, k3, k4, k5, k6 = jax.random.split(key, 7)
        w1 = 0.01 * jax.random.normal(k1, (out_ch, in_ch, kernel_size), jnp.float32)
        b1 = 0.01 * jax.random.normal(k2, (out_ch,), jnp.float32)
        w2 = 0.01 * jax.random.normal(k3, (out_ch, out_ch, kernel_size), jnp.float32)
        b2 = 0.01 * jax.random.normal(k4, (out_ch,), jnp.float32)
        if in_ch != out_ch:
            wd = 0.01 * jax.random.normal(k5, (out_ch, in_ch, 1), jnp.float32)
            bd = 0.01 * jax.random.normal(k6, (out_ch,), jnp.float32)
        else:
            wd, bd = None, None
        params.append((w1, b1, w2, b2, wd, bd))
    return params


# --------------------------------------------------------------------------- #
# Pure-JAX reference (mirrors PyTorch Conv1d(pad) + Chomp1d + block structure)
# --------------------------------------------------------------------------- #
def _ref_causal_conv(x, w, b, dilation):
    B, c_in, L = x.shape
    c_out, _, K = w.shape
    pad = (K - 1) * dilation
    xp = jnp.pad(x, ((0, 0), (0, 0), (pad, 0)))
    out = jnp.zeros((B, c_out, L), jnp.float32)
    for k in range(K):
        out = out + jnp.einsum("oi,bil->bol",
                               w[:, :, k].astype(jnp.float32),
                               xp[:, :, k * dilation:k * dilation + L].astype(jnp.float32))
    return out + b.astype(jnp.float32)[None, :, None]


def reference_tcn(x, all_params):
    out = x.astype(jnp.float32)
    for i, (w1, b1, w2, b2, wd, bd) in enumerate(all_params):
        d = 2 ** i
        h = jax.nn.relu(_ref_causal_conv(out, w1, b1, d))
        y = jax.nn.relu(_ref_causal_conv(h, w2, b2, d))
        res = out if wd is None else _ref_causal_conv(out, wd, bd, 1)
        out = jax.nn.relu(y + res)
    return out.astype(x.dtype)


if __name__ == "__main__":
    key = jax.random.PRNGKey(0)
    key, kx1, kx2 = jax.random.split(key, 3)

    C_in, num_channels, kernel_size = 4, [8, 8], 2
    params = init_tcn_params(key, C_in, num_channels, kernel_size)

    # Small shapes: batch=2, channels=4, seq=16 (single 128-wide time tile).
    B, L = 2, 16
    x = jax.random.normal(kx1, (B, C_in, L), jnp.float32)
    ref = reference_tcn(x, params)

    # f32 activation path: bitwise-tight check of the fused kernel math.
    out_f32 = jax.block_until_ready(
        temporal_conv_net(x, params, activation_dtype=jnp.float32))
    assert out_f32.shape == (B, num_channels[-1], L), out_f32.shape
    assert jnp.allclose(out_f32, ref, rtol=1e-4, atol=1e-5), \
        float(jnp.max(jnp.abs(out_f32 - ref)))

    # Default bf16 activation streaming (HBM-bandwidth optimization): looser tolerance.
    out_bf16 = jax.block_until_ready(temporal_conv_net(x, params))
    assert out_bf16.shape == (B, num_channels[-1], L), out_bf16.shape
    assert jnp.allclose(out_bf16, ref, rtol=5e-2, atol=1e-2), \
        float(jnp.max(jnp.abs(out_bf16 - ref)))

    # Longer sequence with two 128-wide time tiles: exercises the cross-tile
    # causal-history carry (Chomp1d semantics across tile boundaries).
    B2, L2 = 2, 200
    x2 = jax.random.normal(kx2, (B2, C_in, L2), jnp.float32)
    ref2 = reference_tcn(x2, params)
    out2 = jax.block_until_ready(
        temporal_conv_net(x2, params, time_tile=128, activation_dtype=jnp.float32))
    assert out2.shape == (B2, num_channels[-1], L2), out2.shape
    assert jnp.allclose(out2, ref2, rtol=1e-4, atol=1e-5), \
        float(jnp.max(jnp.abs(out2 - ref2)))
    out2b = jax.block_until_ready(temporal_conv_net(x2, params, time_tile=128))
    assert jnp.allclose(out2b, ref2, rtol=5e-2, atol=1e-2), \
        float(jnp.max(jnp.abs(out2b - ref2)))

    print("KERNEL_OK")
</pallas_src>

<mosaic_0001>
module attributes {stable_mosaic.version = 11 : i64} {
  func.func @_block_kernel(%arg0: i32, %arg1: i32, %arg2: memref<1x8x128xf32, #tpu.memory_space<vmem>>, %arg3: memref<2x16x8xf32, #tpu.memory_space<vmem>>, %arg4: memref<8x1xf32, #tpu.memory_space<vmem>>, %arg5: memref<2x8x8xf32, #tpu.memory_space<vmem>>, %arg6: memref<8x1xf32, #tpu.memory_space<vmem>>, %arg7: memref<8x1xf32, #tpu.memory_space<vmem>>, %arg8: memref<1x8x128xf32, #tpu.memory_space<vmem>>, %arg9: memref<8x129xf32, #tpu.memory_space<vmem>>, %arg10: memref<8x129xf32, #tpu.memory_space<vmem>>) attributes {dimension_semantics = [#tpu.dimension_semantics<parallel>, #tpu.dimension_semantics<arbitrary>], iteration_bounds = array<i64: 2, 1>, scalar_prefetch = 0 : i64, scratch_operands = 2 : i64, tpu.core_type = #tpu.core_type<tc>, window_params = [{transform_indices = @transform_0, window_bounds = array<i64: 1, 8, 128>}, {pipeline_mode = #tpu.pipeline_mode<synchronous>, transform_indices = @transform_1, window_bounds = array<i64: 2, 16, 8>}, {pipeline_mode = #tpu.pipeline_mode<synchronous>, transform_indices = @transform_2, window_bounds = array<i64: 8, 1>}, {pipeline_mode = #tpu.pipeline_mode<synchronous>, transform_indices = @transform_3, window_bounds = array<i64: 2, 8, 8>}, {pipeline_mode = #tpu.pipeline_mode<synchronous>, transform_indices = @transform_4, window_bounds = array<i64: 8, 1>}, {pipeline_mode = #tpu.pipeline_mode<synchronous>, transform_indices = @transform_5, window_bounds = array<i64: 8, 1>}, {transform_indices = @transform_6, window_bounds = array<i64: 1, 8, 128>}]} {
    %c0 = arith.constant 0 : index
    %c0_0 = arith.constant 0 : index
    %c0_1 = arith.constant 0 : index
    %0 = vector.load %arg2[%c0, %c0_0, %c0_1] : memref<1x8x128xf32, #tpu.memory_space<vmem>>, vector<1x8x128xf32>
    %1 = vector.shape_cast %0 : vector<1x8x128xf32> to vector<8x128xf32>
    %c0_i32 = arith.constant 0 : i32
    %2 = arith.cmpi eq, %arg1, %c0_i32 : i32
    %3 = arith.extui %2 : i1 to i32
    %c0_i32_2 = arith.constant 0 : i32
    %4 = arith.cmpi ne, %3, %c0_i32_2 : i32
    scf.if %4 {
      %cst_44 = arith.constant 0.000000e+00 : f32
      %48 = vector.broadcast %cst_44 : f32 to vector<8x1xf32>
      %c0_45 = arith.constant 0 : index
      %c0_46 = arith.constant 0 : index
      %49 = vector.load %arg9[%c0_45, %c0_46] : memref<8x129xf32, #tpu.memory_space<vmem>>, vector<8x1xf32>
      tpu.vector_store %arg9[%c0_45, %c0_46], %48 {strides = array<i32>} : memref<8x129xf32, #tpu.memory_space<vmem>>, vector<8x1xf32>,
      %cst_47 = arith.constant 0.000000e+00 : f32
      %50 = vector.broadcast %cst_47 : f32 to vector<8x1xf32>
      %c0_48 = arith.constant 0 : index
      %c0_49 = arith.constant 0 : index
      %51 = vector.load %arg10[%c0_48, %c0_49] : memref<8x129xf32, #tpu.memory_space<vmem>>, vector<8x1xf32>
      tpu.vector_store %arg10[%c0_48, %c0_49], %50 {strides = array<i32>} : memref<8x129xf32, #tpu.memory_space<vmem>>, vector<8x1xf32>,
    } else {
    }
    %c0_3 = arith.constant 0 : index
    %c1 = arith.constant 1 : index
    %5 = vector.load %arg9[%c0_3, %c1] : memref<8x129xf32, #tpu.memory_space<vmem>>, vector<8x128xf32>
    tpu.vector_store %arg9[%c0_3, %c1], %1 {strides = array<i32>} : memref<8x129xf32, #tpu.memory_space<vmem>>, vector<8x128xf32>,
    %c1_4 = arith.constant 1 : index
    %c0_5 = arith.constant 0 : index
    %c0_6 = arith.constant 0 : index
    %6 = vector.load %arg3[%c1_4, %c0_5, %c0_6] : memref<2x16x8xf32, #tpu.memory_space<vmem>>, vector<1x16x8xf32>
    %7 = vector.shape_cast %6 : vector<1x16x8xf32> to vector<16x8xf32>
    %cst = arith.constant dense<0.000000e+00> : vector<16x128xf32>
    %8 = tpu.matmul %7, %1, %cst {dimension_numbers = #tpu.dot_dimension_numbers<[1], [0], [0], [1], [0, 0, 1, 1], [], []>} : vector<16x8xf32>, vector<8x128xf32>, vector<16x128xf32> -> vector<16x128xf32>
    %c0_7 = arith.constant 0 : index
    %c0_8 = arith.constant 0 : index
    %c0_9 = arith.constant 0 : index
    %9 = vector.load %arg3[%c0_7, %c0_8, %c0_9] : memref<2x16x8xf32, #tpu.memory_space<vmem>>, vector<1x16x8xf32>
    %10 = vector.shape_cast %9 : vector<1x16x8xf32> to vector<16x8xf32>
    %c0_10 = arith.constant 0 : index
    %c0_11 = arith.constant 0 : index
    %11 = vector.load %arg9[%c0_10, %c0_11] : memref<8x129xf32, #tpu.memory_space<vmem>>, vector<8x128xf32>
    %cst_12 = arith.constant dense<0.000000e+00> : vector<16x128xf32>
    %12 = tpu.matmul %10, %11, %cst_12 {dimension_numbers = #tpu.dot_dimension_numbers<[1], [0], [0], [1], [0, 0, 1, 1], [], []>} : vector<16x8xf32>, vector<8x128xf32>, vector<16x128xf32> -> vector<16x128xf32>
    %13 = arith.addf %8, %12 : vector<16x128xf32>
    %14 = vector.extract_strided_slice %13 {offsets = [0, 0], sizes = [8, 128], strides = [1, 1]} : vector<16x128xf32> to vector<8x128xf32>
    %c0_13 = arith.constant 0 : index
    %c0_14 = arith.constant 0 : index
    %15 = vector.load %arg4[%c0_13, %c0_14] : memref<8x1xf32, #tpu.memory_space<vmem>>, vector<8x1xf32>
    %16 = vector.broadcast %15 : vector<8x1xf32> to vector<8x128xf32>
    %17 = arith.addf %14, %16 : vector<8x128xf32>
    %cst_15 = arith.constant 0.000000e+00 : f32
    %18 = vector.broadcast %cst_15 : f32 to vector<8x128xf32>
    %19 = arith.maximumf %17, %18 : vector<8x128xf32>
    %20 = vector.extract_strided_slice %13 {offsets = [8, 0], sizes = [8, 128], strides = [1, 1]} : vector<16x128xf32> to vector<8x128xf32>
    %c0_16 = arith.constant 0 : index
    %c0_17 = arith.constant 0 : index
    %21 = vector.load %arg7[%c0_16, %c0_17] : memref<8x1xf32, #tpu.memory_space<vmem>>, vector<8x1xf32>
    %22 = vector.broadcast %21 : vector<8x1xf32> to vector<8x128xf32>
    %23 = arith.addf %20, %22 : vector<8x128xf32>
    %c0_18 = arith.constant 0 : index
    %c1_19 = arith.constant 1 : index
    %24 = vector.load %arg10[%c0_18, %c1_19] : memref<8x129xf32, #tpu.memory_space<vmem>>, vector<8x128xf32>
    tpu.vector_store %arg10[%c0_18, %c1_19], %19 {strides = array<i32>} : memref<8x129xf32, #tpu.memory_space<vmem>>, vector<8x128xf32>,
    %c1_20 = arith.constant 1 : index
    %c0_21 = arith.constant 0 : index
    %c0_22 = arith.constant 0 : index
    %25 = vector.load %arg5[%c1_20, %c0_21, %c0_22] : memref<2x8x8xf32, #tpu.memory_space<vmem>>, vector<1x8x8xf32>
    %26 = vector.shape_cast %25 : vector<1x8x8xf32> to vector<8x8xf32>
    %cst_23 = arith.constant dense<0.000000e+00> : vector<8x128xf32>
    %27 = tpu.matmul %26, %19, %cst_23 {dimension_numbers = #tpu.dot_dimension_numbers<[1], [0], [0], [1], [0, 0, 1, 1], [], []>} : vector<8x8xf32>, vector<8x128xf32>, vector<8x128xf32> -> vector<8x128xf32>
    %c0_24 = arith.constant 0 : index
    %c0_25 = arith.constant 0 : index
    %c0_26 = arith.constant 0 : index
    %28 = vector.load %arg5[%c0_24, %c0_25, %c0_26] : memref<2x8x8xf32, #tpu.memory_space<vmem>>, vector<1x8x8xf32>
    %29 = vector.shape_cast %28 : vector<1x8x8xf32> to vector<8x8xf32>
    %c0_27 = arith.constant 0 : index
    %c0_28 = arith.constant 0 : index
    %30 = vector.load %arg10[%c0_27, %c0_28] : memref<8x129xf32, #tpu.memory_space<vmem>>, vector<8x128xf32>
    %cst_29 = arith.constant dense<0.000000e+00> : vector<8x128xf32>
    %31 = tpu.matmul %29, %30, %cst_29 {dimension_numbers = #tpu.dot_dimension_numbers<[1], [0], [0], [1], [0, 0, 1, 1], [], []>} : vector<8x8xf32>, vector<8x128xf32>, vector<8x128xf32> -> vector<8x128xf32>
    %32 = arith.addf %27, %31 : vector<8x128xf32>
    %c0_30 = arith.constant 0 : index
    %c0_31 = arith.constant 0 : index
    %33 = vector.load %arg6[%c0_30, %c0_31] : memref<8x1xf32, #tpu.memory_space<vmem>>, vector<8x1xf32>
    %34 = vector.broadcast %33 : vector<8x1xf32> to vector<8x128xf32>
    %35 = arith.addf %32, %34 : vector<8x128xf32>
    %cst_32 = arith.constant 0.000000e+00 : f32
    %36 = vector.broadcast %cst_32 : f32 to vector<8x128xf32>
    %37 = arith.maximumf %35, %36 : vector<8x128xf32>
    %38 = arith.addf %37, %23 : vector<8x128xf32>
    %cst_33 = arith.constant 0.000000e+00 : f32
    %39 = vector.broadcast %cst_33 : f32 to vector<8x128xf32>
    %40 = arith.maximumf %38, %39 : vector<8x128xf32>
    %c0_34 = arith.constant 0 : index
    %c0_35 = arith.constant 0 : index
    %c0_36 = arith.constant 0 : index
    %41 = vector.load %arg8[%c0_34, %c0_35, %c0_36] : memref<1x8x128xf32, #tpu.memory_space<vmem>>, vector<1x8x128xf32>
    %42 = vector.shape_cast %41 : vector<1x8x128xf32> to vector<8x128xf32>
    %43 = vector.shape_cast %40 : vector<8x128xf32> to vector<1x8x128xf32>
    tpu.vector_store %arg8[%c0_34, %c0_35, %c0_36], %43 {strides = array<i32>} : memref<1x8x128xf32, #tpu.memory_space<vmem>>, vector<1x8x128xf32>,
    %c0_37 = arith.constant 0 : index
    %c128 = arith.constant 128 : index
    %44 = vector.load %arg9[%c0_37, %c128] : memref<8x129xf32, #tpu.memory_space<vmem>>, vector<8x1xf32>
    %c0_38 = arith.constant 0 : index
    %c0_39 = arith.constant 0 : index
    %45 = vector.load %arg9[%c0_38, %c0_39] : memref<8x129xf32, #tpu.memory_space<vmem>>, vector<8x1xf32>
    tpu.vector_store %arg9[%c0_38, %c0_39], %44 {strides = array<i32>} : memref<8x129xf32, #tpu.memory_space<vmem>>, vector<8x1xf32>,
    %c0_40 = arith.constant 0 : index
    %c128_41 = arith.constant 128 : index
    %46 = vector.load %arg10[%c0_40, %c128_41] : memref<8x129xf32, #tpu.memory_space<vmem>>, vector<8x1xf32>
    %c0_42 = arith.constant 0 : index
    %c0_43 = arith.constant 0 : index
    %47 = vector.load %arg10[%c0_42, %c0_43] : memref<8x129xf32, #tpu.memory_space<vmem>>, vector<8x1xf32>
    tpu.vector_store %arg10[%c0_42, %c0_43], %46 {strides = array<i32>} : memref<8x129xf32, #tpu.memory_space<vmem>>, vector<8x1xf32>,
    return
  }
  func.func @transform_0(%arg0: i32, %arg1: i32) -> (i32, i32, i32) {
    %c0_i32 = arith.constant 0 : i32
    %c0_i32_0 = arith.constant 0 : i32
    return %arg0, %c0_i32, %arg1 : i32, i32, i32
  }
  func.func @transform_1(%arg0: i32, %arg1: i32) -> (i32, i32, i32) {
    %c0_i32 = arith.constant 0 : i32
    %c0_i32_0 = arith.constant 0 : i32
    %c0_i32_1 = arith.constant 0 : i32
    %c0_i32_2 = arith.constant 0 : i32
    return %c0_i32, %c0_i32_0, %c0_i32_1 : i32, i32, i32
  }
  func.func @transform_2(%arg0: i32, %arg1: i32) -> (i32, i32) {
    %c0_i32 = arith.constant 0 : i32
    %c0_i32_0 = arith.constant 0 : i32
    %c0_i32_1 = arith.constant 0 : i32
    return %c0_i32, %c0_i32_0 : i32, i32
  }
  func.func @transform_3(%arg0: i32, %arg1: i32) -> (i32, i32, i32) {
    %c0_i32 = arith.constant 0 : i32
    %c0_i32_0 = arith.constant 0 : i32
    %c0_i32_1 = arith.constant 0 : i32
    %c0_i32_2 = arith.constant 0 : i32
    return %c0_i32, %c0_i32_0, %c0_i32_1 : i32, i32, i32
  }
  func.func @transform_4(%arg0: i32, %arg1: i32) -> (i32, i32) {
    %c0_i32 = arith.constant 0 : i32
    %c0_i32_0 = arith.constant 0 : i32
    %c0_i32_1 = arith.constant 0 : i32
    return %c0_i32, %c0_i32_0 : i32, i32
  }
  func.func @transform_5(%arg0: i32, %arg1: i32) -> (i32, i32) {
    %c0_i32 = arith.constant 0 : i32
    %c0_i32_0 = arith.constant 0 : i32
    %c0_i32_1 = arith.constant 0 : i32
    return %c0_i32, %c0_i32_0 : i32, i32
  }
  func.func @transform_6(%arg0: i32, %arg1: i32) -> (i32, i32, i32) {
    %c0_i32 = arith.constant 0 : i32
    %c0_i32_0 = arith.constant 0 : i32
    return %arg0, %c0_i32, %arg1 : i32, i32, i32
  }
}

</mosaic_0001>

<bundles_post_ra>
// kernel: tpu_custom_call.1
= control target key start
LH: loop header
LB: loop body
LE: loop exit
PB: predicated region body
PF: predicated region fallthrough
CT: control target
= control target key end

     0   :  { %11 = vsyncpa [#allocation5], 0  ;;  %s1100_s0 = inlined_call_operand.vmem [shape: f32[2,8,128], index: 0, kind: input, shape index: {}]   ;;  %s1101_s1 = inlined_call_operand.vmem [shape: f32[2,16,8], index: 1, kind: input, shape index: {}]   ;;  %s1102_s2 = inlined_call_operand.vmem [shape: f32[8,1], index: 2, kind: input, shape index: {}]   ;;  %s1103_s3 = inlined_call_operand.vmem [shape: f32[2,8,8], index: 3, kind: input, shape index: {}]   ;;  %s1104_s4 = inlined_call_operand.vmem [shape: f32[8,1], index: 4, kind: input, shape index: {}]   ;;  %s1105_s5 = inlined_call_operand.vmem [shape: f32[8,1], index: 5, kind: input, shape index: {}]   ;;  %s1106_s6 = inlined_call_operand.hbm [shape: f32[2,8,128], index: 6, kind: output, shape index: {}]  }
   0x1   :  { %13 = vsyncpa [#allocation5 + $0x1], 0  ;;  %s958_s21 = smov 0   ;;  %s960_s22 = smov 0  }
   0x2   :  { %s962_s23 = smov 0   ;;  %s964_s24 = smov 0  }
   0x3   :  { %s966_s25 = smov 0   ;;  %s968_s26 = smov 0  }
   0x4 LB: > { %s729_s27 = sadd.s32 4294967295, %s916_s26   ;;  %s730_s28 = sadd.s32 4294967294, %s916_s26   ;;  %s916_s26 = sphi %s968_s26, %s19_s26   ;;  %s912_s25 = sphi %s966_s25, %s1113_s25   ;;  %s908_s24 = sphi %s964_s24, %s1112_s24   ;;  %s904_s23 = sphi %s962_s23, %s1111_s23   ;;  %s900_s22 = sphi %s960_s22, %s1110_s22   ;;  %s896_s21 = sphi %s958_s21, %s1109_s21  }
   0x5   : > { %s31_s29 = sadd.s32 1, %s912_s25  ;;  %s173_s30 = sadd.s32 1, %s904_s23 }
   0x6   : > { %p33_p0 = scmp.ge.s32.totalorder %s31_s29, 2  ;;  %p183_p1 = scmp.ne.s32.totalorder %s904_s23, %s900_s22 }
   0x7   : > { %p184_p2 = scmp.eq.s32.totalorder %s729_s27, 1  ;;  %p189_p3 = scmp.ne.s32.totalorder %s900_s22, %s896_s21 }
   0x8   : > { %s1115_s29 = smov (%p33_p0, %s31_s29), 0  ;;  %p190_p5 = scmp.eq.s32.totalorder %s730_s28, 1 }
   0x9   : > { %p998_p4 = por %p184_p2, %p183_p1  ;;  %s168_s8 = ssub.s32 %s912_s25, %s1115_s29 }
   0xa   : > { %p733_p6 = scmp.ge.s32.totalorder %s916_s26, 1  ;;  %p171_p7 = scmp.eq.s32.totalorder %s168_s8, 0 }
   0xb   : > { %p1005_p8 = por %p190_p5, %p189_p3  ;;  %p233_p9 = scmp.lt.s32.totalorder %s916_s26, 3 }
   0xc   : > { %s1011_s10 = scalar_select %p171_p7, %s904_s23, %s173_s30  }
   0xd   : > { %p234_p10 = pnand %p733_p6, %p233_p9 }
   0xe   : > { %p265_p11 = scmp.lt.s32.totalorder (!%p234_p10), %s908_s24, 1  ;;  %s920_s28 = smov (!%p234_p10), 1  }
   0xf   : > { %237 = sbr.rel (%p234_p10) target bundleno = 691 (0x2b3), region = 44  ;;  %s262_s27 = sand.u32 (!%p234_p10), 1, %s900_s22  }
  0x10   : > { %s746_s30 = sshll.u32 (!%p234_p10), %s908_s24, 7  ;;  %s644_s15 = scalar_lea.sflag (!%p234_p10), [#allocation5], %s262_s27 }
  0x11   : > { %s656_s14 = scalar_lea.hbm (!%p234_p10), %s1106_s6, %s746_s30  ;;  %s922_s17 = smov (!%p234_p10), [#allocation4]  }
  0x12   : > { %s844_s18 = sshll.u32 (!%p234_p10), %s922_s17, 4  ;;  %s845_s18 = int_to_ptr.vmem [resolvable:$false] %s844_s18 }
  0x14   : > { %vm277_vm0 = vcmask 7168   ;;  %v736_v0 = vld [vmem:[%s1101_s1 + $0x10] sm:$0xff]  ;;  %v918_v1 = vmov 0.0   ;;  %vm294_vm1 = vcmask 64512   ;;  %s266_s13 = scalar_select %p265_p11, %s908_s24, 1  ;;  %v291_v2 = vld [vmem:[%s1101_s1] sm:$0xff] }
  0x15   : > { %278 = vst.msk [vmem:[#allocation2] sm:$0xff] %vm277_vm0, %v918_v1  ;;  %279 = vst.msk [vmem:[#allocation3] sm:$0xff] %vm277_vm0, %v918_v1  ;;  %766 = vmatprep.mubr.msk.f32.mxu1 %vm294_vm1, %v736_v0  ;;  %761 = vmatprep.mubr.msk.f32.mxu0 %vm294_vm1, %v291_v2  ;;  %v919_v3 = vmov 0   ;;  %v737_v5 = vld [vmem:[%s1101_s1 + $0x18] sm:$0xff]  ;;  %v457_v6 = vld [vmem:[%s1102_s2] sm:$0xff]  ;;  %vm284_vm2 = vcmask 1047560  }
  0x16   : > { %s735_s16 = sshll.u32 %s266_s13, 3  ;;  %838 = vset.pattern.permute.xlu0 %v919_v3  ;;  %839 = vset.pattern.permute.xlu1 %v919_v3  ;;  %v292_v10 = vld [vmem:[%s1101_s1 + $0x8] sm:$0xff]  ;;  %vm921_vm3 = vmmov 0   ;;  %v628_v20 = vld [vmem:[%s1104_s4] sm:$0xff]  ;;  %s846_s24 = scalar_lea.vmem %s845_s18, 256 }
  0x17   : > { %s271_s19 = scalar_lea.vmem %s1100_s0, %s735_s16  ;;  %v742_v19 = vld [vmem:[%s1103_s3 + $0x8] sm:$0xff]  ;;  %v465_v21 = vld [vmem:[%s1105_s5] sm:$0xff] }
  0x18   : > { %v272_v4 = vld [vmem:[%s271_s19] sm:$0xff] }
  0x19   : > { %281 = vrot.lane.b32.xlu0 %v272_v4, %s920_s28  ;;  %764 = vmatprep.subr.mxu1 %v272_v4  ;;  %v480_v23 = vld [vmem:[%s1103_s3] sm:$0xff] }
  0x1a   : > { %765 = vmatpush3.msra.mxu1 %v272_v4 }
  0x1b   : > { %767 = vmatmul.mubr.msk.f32.vlgmr.msra.gmra.mxu1 %vm294_vm1, %v737_v5  ;;  %774 = vmatprep.subr.mxu1 %v918_v1 }
  0x1c   : > { %776 = vmatprep.mubr.msk.f32.mxu1 %vm921_vm3, %v918_v1 }
  0x1d   : > { %460 = vperm.xlu0 %838, %v457_v6  }
  0x8b   : > { %v282_v7 = vpop.permute.xlu0 %281 }
  0x8c   : > { %285 = vst.msk [vmem:[#allocation2] sm:$0xff] %vm284_vm2, %v282_v7 }
  0x8d   : > { %287 = vst.msk [vmem:[#allocation2 + $0x8] sm:$0xff] %vm277_vm0, %v282_v7 }
  0x93   : > { %v293_v8 = vld [vmem:[#allocation2] sm:$0xff] }
  0x94   : > { %v639_v9 = vld [vmem:[#allocation2 + $0x8] sm:$0xff]  ;;  %759 = vmatprep.subr.mxu0 %v293_v8 }
  0x95   : > { %640 = vst.msk [vmem:[#allocation2] sm:$0xff] %vm277_vm0, %v639_v9  ;;  %760 = vmatpush3.msra.mxu0 %v293_v8 }
  0x96   : > { %762 = vmatmul.mubr.msk.f32.vlgmr.msra.gmra.mxu0 %vm294_vm1, %v292_v10  ;;  %769 = vmatprep.subr.mxu0 %v918_v1 }
  0x97   : > { %771 = vmatprep.mubr.msk.f32.mxu0 %vm921_vm3, %v918_v1 }
  0x98   : > { %v461_v13 = vpop.permute.xlu0 %460 }
  0xdb   : > { %v768_v11 = vpop.f32.mrf.mxu1 }
  0xdd   : > { %v448_v14 = vpop.f32.mrf.mxu1 }
 0x156   : > { %v763_v12 = vpop.f32.mrf.mxu0 }
 0x157   : > { %v454_v33 = vadd.f32 %v768_v11, %v763_v12 }
 0x158   : > { %v367_v15 = vpop.f32.mrf.mxu0 }
 0x159   : > { %v449_v16 = vadd.f32 %v448_v14, %v367_v15 }
 0x15b   : > { %v463_v17 = vadd.f32 %v461_v13, %v449_v16 }
 0x15d   : > { %v464_v18 = vmax.f32 %v463_v17, 0.0 }
 0x15f   : > { %473 = vrot.lane.b32.xlu1 %v464_v18, %s920_s28  ;;  %775 = vmatpush3.msra.mxu1 %v464_v18  ;;  %s734_s28 = sshll.u32 %s262_s27, 3 }
 0x160   : > { %777 = vmatmul.mubr.msk.f32.vlgmr.msra.gmra.mxu1 %vm294_vm1, %v742_v19  ;;  %s264_s8 = scalar_lea.vmem [#allocation4], %s734_s28 }
 0x161   : > { %s658_s11 = sshll.u32 %s264_s8, 4  ;;  %s659_s11 = int_to_ptr.vmem [resolvable:$true] %s658_s11 }
 0x162   : > { %s840_s16 = scalar_lea.vmem %s659_s11, 128  ;;  %p847_p1 = scmp.lt.s32.totalorder %s659_s11, %s845_s18 }
 0x163   : > { %631 = vperm.xlu1 %839, %v628_v20   ;;  %p841_p12 = scmp.ne.s32.totalorder %s659_s11, %s840_s16  ;;  %p848_p2 = scmp.lt.s32.totalorder %s846_s24, %s840_s16 }
 0x165   : > { %p842_p13 = pnand %p841_p12, %p998_p4  ;;  %p849_p3 = por %p848_p2, %p847_p1 }
 0x167   : > { %468 = vperm.xlu1 %839, %v465_v21   ;;  %p843_p0 = pneg %p842_p13 }
 0x169   : > { %p850_p5 = pnand %p849_p3, %p843_p0 }
 0x1d1   : > { %v474_v22 = vpop.permute.xlu1 %473 }
 0x1d2   : > { %476 = vst.msk [vmem:[#allocation3] sm:$0xff] %vm284_vm2, %v474_v22 }
 0x1d3   : > { %477 = vst.msk [vmem:[#allocation3 + $0x8] sm:$0xff] %vm277_vm0, %v474_v22 }
 0x1d9   : > { %v481_v24 = vld [vmem:[#allocation3] sm:$0xff] }
 0x1da   : > { %v641_v25 = vld [vmem:[#allocation3 + $0x8] sm:$0xff]  ;;  %770 = vmatpush3.msra.mxu0 %v481_v24 }
 0x1db   : > { %642 = vst.msk [vmem:[#allocation3] sm:$0xff] %vm277_vm0, %v641_v25  ;;  %772 = vmatmul.mubr.msk.f32.vlgmr.msra.gmra.mxu0 %vm294_vm1, %v480_v23 }
 0x1de   : > { %v632_v28 = vpop.permute.xlu1 %631 }
 0x1e2   : > { %v469_v31 = vpop.permute.xlu1 %468 }
 0x1e3   : > { %v471_v35 = vadd.f32 %v469_v31, %v454_v33 }
 0x220   : > { %v624_v26 = vpop.f32.mrf.mxu1 }
 0x222   : > { %v778_v27 = vpop.f32.mrf.mxu1 }
 0x29b   : > { %v551_v29 = vpop.f32.mrf.mxu0 }
 0x29c   : > { %v625_v30 = vadd.f32 %v624_v26, %v551_v29 }
 0x29d   : > { %v773_v32 = vpop.f32.mrf.mxu0 }
 0x29e   : > { %v634_v34 = vadd.f32 %v632_v28, %v625_v30 }
 0x2a0   : > { %v635_v36 = vmax.f32 %v634_v34, 0.0 }
 0x2a2   : > { %v636_v37 = vadd.f32 %v635_v36, %v471_v35 }
 0x2a4   : > { %v637_v38 = vmax.f32 %v636_v37, 0.0 }
 0x2a6   : > { %638 = vst [vmem:[%s264_s8] sm:$0xff] %v637_v38 }
 0x2a7   : > { %853 = shalt.err (!%p850_p5)
}
 0x2a8   : > { %s854_s19 = scalar_lea.hbm %s656_s14, 128  ;;  %s858_s28 = scalar_lea.hbm %s1106_s6, 256 }
 0x2a9   : > { %p855_p6 = scmp.ne.s32.totalorder %s656_s14, %s854_s19  ;;  %p859_p10 = scmp.lt.s32.totalorder %s656_s14, %s1106_s6 }
 0x2aa   : > { %p860_p11 = scmp.lt.s32.totalorder %s858_s28, %s854_s19 }
 0x2ab   : > { %p856_p7 = pnand %p855_p6, %p998_p4 }
 0x2ac   : > { %p861_p12 = por %p860_p11, %p859_p10 }
 0x2ad   : > { %p857_p9 = pneg %p856_p7 }
 0x2af   : > { %p862_p13 = pnand %p861_p12, %p857_p9 }
 0x2b1   : > { %865 = shalt.err (!%p862_p13)
}
 0x2b2   : > { %779 = dma.vmem_to_hbm [thread:$0]  (%p998_p4), %s659_s11, 128, %s656_s14, %s644_s15  }
 0x2b3 PF: > { %p785_p0 = scmp.ge.s32.totalorder %s916_s26, 2  ;;  %s670_s12 = sand.u32 1, %s896_s21  }
 0x2b4   : > { %s671_s13 = scalar_lea.sflag [#allocation5], %s670_s12 }
 0x2b5   : > { %p782_p1 = pnand %p785_p0, %p1005_p8 }
 0x2b7   : > { %p783_p2 = pneg %p782_p1 }
 0x2b9   : > { %891 = dma.done.wait (%p783_p2), %s671_s13, 128  }
 0x2ba   : > { %893 = vsyncadd (%p783_p2), %s671_s13, 4294967168  ;;  %s19_s26 = sadd.s32 1, %s916_s26   ;;  %s1109_s21 = smov %s900_s22 }
 0x2bb   : > { %p16_p3 = scmp.ge.s32.totalorder %s19_s26, 4   ;;  %s1110_s22 = smov %s904_s23 }
 0x2bc   : > { %s1111_s23 = smov %s1011_s10  ;;  %s1112_s24 = smov %s912_s25 }
 0x2bd   : > { %s1113_s25 = smov %s1115_s29  ;;  %18 = sbr.rel (!%p16_p3) target bundleno = 4 (0x4), region = 85 }
 0x2c2   :  { %676 = vsyncpa [#allocation5], 1 }
 0x2c3   :  { %678 = vsyncpa [#allocation5 + $0x1], 1 }

</bundles_post_ra>
